<compile_context>
chip_gen: v6e
topology: v6e:2x2x1
jax: 0.10.0
libtpu: 0.0.40
codegen_flags: <defaults>
</compile_context>

<pallas_src>
import jax
import jax.numpy as jnp
from jax.experimental import pallas as pl
from jax.experimental.pallas import tpu as pltpu


def _round_up(v, m):
    return (v + m - 1) // m * m


def _patch_matmul_kernel(x_ref, w_ref, o_ref):
    # x_ref: (TM, K) flattened patches; w_ref: (K, TN) projection; o_ref: (TM, TN).
    # Full K depth per tile -> no accumulator scratch; write straight out.
    o_ref[...] = jnp.dot(
        x_ref[...], w_ref[...], preferred_element_type=jnp.float32
    ).astype(o_ref.dtype)


def patch_embed_2d(x, weight, patch_size, *, compute_dtype=None):
    """Forward pass of PatchEmbed2D (norm_layer=None).

    x:      (B, C, H, W)  NCHW (PyTorch layout)
    weight: (embed_dim, C, p, p)  PyTorch Conv2d weight (OIHW)
    compute_dtype: optional matmul input dtype (e.g. jnp.bfloat16 halves HBM
        bytes and doubles MXU rate; accumulation stays f32). Default: x.dtype.
    returns (B, H//p, W//p, embed_dim)  ==  conv(x).permute(0, 2, 3, 1)
    """
    if isinstance(patch_size, int):
        ph = pw = patch_size
    else:
        ph, pw = patch_size
    B, C, H, W = x.shape
    E = weight.shape[0]
    Hp, Wp = H // ph, W // pw
    M = B * Hp * Wp
    K = C * ph * pw

    cdt = compute_dtype if compute_dtype is not None else x.dtype

    # ---- Patch extraction (XLA space-to-depth glue). ----
    xs = x.astype(cdt)
    if H != Hp * ph or W != Wp * pw:
        xs = xs[:, :, : Hp * ph, : Wp * pw]      # conv drops the spatial remainder
    xp = xs.reshape(B, C, Hp, ph, Wp, pw)
    xp = jnp.transpose(xp, (0, 2, 4, 1, 3, 5)).reshape(M, K)   # (M, K), K order (c,kh,kw)
    wm = weight.astype(cdt).reshape(E, K).T                     # (K, E), matching K order
    # TODO(synk): fuse the patchify into the kernel (or accept NHWC inputs
    # upstream) to avoid this single transpose copy of the activation in HBM.

    # ---- Tile selection. ----
    TM = 512 if M >= 512 else _round_up(M, 8)   # biggest tile w/ plenty of VMEM headroom
    if E % 128 == 0 and E > 512:
        TN = next(t for t in (512, 256, 128) if E % t == 0)   # lane-dense N tiles
    else:
        TN = E                                   # single full-width N tile (no pad/slice)
    grid = (pl.cdiv(M, TM), pl.cdiv(E, TN))

    itemsize = jnp.dtype(cdt).itemsize
    cost = pl.CostEstimate(
        flops=2 * M * K * E,
        transcendentals=0,
        bytes_accessed=(M * K + K * E) * itemsize
        + M * E * jnp.dtype(x.dtype).itemsize,
    )

    out = pl.pallas_call(
        _patch_matmul_kernel,
        out_shape=jax.ShapeDtypeStruct((M, E), x.dtype),
        grid_spec=pltpu.PrefetchScalarGridSpec(
            num_scalar_prefetch=0,
            grid=grid,
            in_specs=[
                # Activations: tiled over M, full K depth per tile.
                pl.BlockSpec((TM, K), lambda i, j: (i, 0)),
                # Projection weight: block index ignores i -> DMA'd once per N
                # tile, stays VMEM-resident across the whole M sweep.
                pl.BlockSpec((K, TN), lambda i, j: (0, j)),
            ],
            out_specs=pl.BlockSpec((TM, TN), lambda i, j: (i, j)),
        ),
        compiler_params=pltpu.CompilerParams(
            # Independent output tiles -> shard the grid across both TensorCores.
            dimension_semantics=("parallel", "parallel"),
        ),
        cost_estimate=cost,
    )(xp, wm)

    # Output is exactly (M, E): reshape to (B, Hp, Wp, E) is metadata-only.
    return out.reshape(B, Hp, Wp, E)


# TODO(synk): norm_layer defaults to None in the module, so no normalization is applied.


if __name__ == "__main__":
    key = jax.random.PRNGKey(0)
    k_x, k_w = jax.random.split(key)

    # Small shapes consistent with the module: patch_size=4, in_chans=4,
    # embed_dim=32, batch=2, spatial=16 -> output (2, 4, 4, 32).
    patch_size = 4
    in_chans = 4
    embed_dim = 32
    B, H, W = 2, 16, 16

    x = jax.random.normal(k_x, (B, in_chans, H, W), dtype=jnp.float32)
    weight = 0.02 * jax.random.normal(
        k_w, (embed_dim, in_chans, patch_size, patch_size), dtype=jnp.float32
    )  # deterministic synthetic init

    fwd = jax.jit(patch_embed_2d, static_argnums=2)
    out = jax.block_until_ready(fwd(x, weight, patch_size))

    # Reference check against XLA's conv (same semantics as nn.Conv2d, bias=False).
    ref = jax.lax.conv_general_dilated(
        x, weight,
        window_strides=(patch_size, patch_size),
        padding="VALID",
        dimension_numbers=("NCHW", "OIHW", "NCHW"),
    )
    ref = jnp.transpose(ref, (0, 2, 3, 1))  # .permute(0, 2, 3, 1)

    assert out.shape == (B, H // patch_size, W // patch_size, embed_dim), out.shape
    err = float(jnp.max(jnp.abs(out - ref)))
    assert jnp.allclose(out, ref, atol=1e-4, rtol=1e-4), err

    print("KERNEL_OK")
</pallas_src>

<mosaic_0001>
module attributes {stable_mosaic.version = 11 : i64} {
  func.func @_patch_matmul_kernel(%arg0: i32, %arg1: i32, %arg2: memref<32x64xf32, #tpu.memory_space<vmem>>, %arg3: memref<64x32xf32, #tpu.memory_space<vmem>>, %arg4: memref<32x32xf32, #tpu.memory_space<vmem>>) attributes {dimension_semantics = [#tpu.dimension_semantics<parallel>, #tpu.dimension_semantics<parallel>], iteration_bounds = array<i64: 1, 1>, scalar_prefetch = 0 : i64, scratch_operands = 0 : i64, tpu.core_type = #tpu.core_type<tc>, window_params = [{transform_indices = @transform_0, window_bounds = array<i64: 32, 64>}, {transform_indices = @transform_1, window_bounds = array<i64: 64, 32>}, {transform_indices = @transform_2, window_bounds = array<i64: 32, 32>}]} {
    %c0 = arith.constant 0 : index
    %c0_0 = arith.constant 0 : index
    %0 = vector.load %arg2[%c0, %c0_0] : memref<32x64xf32, #tpu.memory_space<vmem>>, vector<32x64xf32>
    %c0_1 = arith.constant 0 : index
    %c0_2 = arith.constant 0 : index
    %1 = vector.load %arg3[%c0_1, %c0_2] : memref<64x32xf32, #tpu.memory_space<vmem>>, vector<64x32xf32>
    %cst = arith.constant dense<0.000000e+00> : vector<32x32xf32>
    %2 = tpu.matmul %0, %1, %cst {dimension_numbers = #tpu.dot_dimension_numbers<[1], [0], [0], [1], [0, 0, 1, 1], [], []>} : vector<32x64xf32>, vector<64x32xf32>, vector<32x32xf32> -> vector<32x32xf32>
    %c0_3 = arith.constant 0 : index
    %c0_4 = arith.constant 0 : index
    %3 = vector.load %arg4[%c0_3, %c0_4] : memref<32x32xf32, #tpu.memory_space<vmem>>, vector<32x32xf32>
    tpu.vector_store %arg4[%c0_3, %c0_4], %2 {strides = array<i32>} : memref<32x32xf32, #tpu.memory_space<vmem>>, vector<32x32xf32>,
    return
  }
  func.func @transform_0(%arg0: i32, %arg1: i32) -> (i32, i32) {
    %c0_i32 = arith.constant 0 : i32
    %c0_i32_0 = arith.constant 0 : i32
    return %arg0, %c0_i32 : i32, i32
  }
  func.func @transform_1(%arg0: i32, %arg1: i32) -> (i32, i32) {
    %c0_i32 = arith.constant 0 : i32
    %c0_i32_0 = arith.constant 0 : i32
    return %c0_i32, %arg1 : i32, i32
  }
  func.func @transform_2(%arg0: i32, %arg1: i32) -> (i32, i32) {
    %c0_i32 = arith.constant 0 : i32
    return %arg0, %arg1 : i32, i32
  }
}

</mosaic_0001>

<bundles_post_ra>
// kernel: patch_embed_2d.1
= control target key start
LH: loop header
LB: loop body
LE: loop exit
PB: predicated region body
PF: predicated region fallthrough
CT: control target
= control target key end

     0   :  { %s279_s0 = inlined_call_operand.vmem [shape: f32[32,64], index: 0, kind: input, shape index: {}]   ;;  %s280_s1 = inlined_call_operand.vmem [shape: f32[64,32], index: 1, kind: input, shape index: {}]   ;;  %s281_s2 = inlined_call_operand.hbm [shape: f32[32,32], index: 2, kind: output, shape index: {}]  }
   0x1   :  { %v23_v0 = vld [vmem:[%s280_s1 + $0x38] sm:$0xff]  ;;  %v22_v1 = vld [vmem:[%s280_s1 + $0x30] sm:$0xff]  ;;  %v21_v2 = vld [vmem:[%s280_s1 + $0x28] sm:$0xff] }
   0x2   :  { %159 = vmatprep.subr.mxu0 %v23_v0  ;;  %181 = vmatprep.subr.mxu1 %v23_v0  ;;  %v20_v3 = vld [vmem:[%s280_s1 + $0x20] sm:$0xff] }
   0x3   :  { %160 = vmatpush3.msra.mxu0 %v23_v0  ;;  %189 = vmatpush3.msra.mxu1 %v23_v0 }
   0x4   :  { %161 = vmatprep.subr.mxu0 %v22_v1  ;;  %182 = vmatprep.subr.mxu1 %v22_v1 }
   0x5   :  { %162 = vmatpush3.msra.mxu0 %v22_v1  ;;  %190 = vmatpush3.msra.mxu1 %v22_v1 }
   0x6   :  { %7 = vsyncpa [#allocation3], 0  ;;  %163 = vmatprep.subr.mxu0 %v21_v2  ;;  %183 = vmatprep.subr.mxu1 %v21_v2  ;;  %v19_v4 = vld [vmem:[%s280_s1 + $0x18] sm:$0xff]  ;;  %v18_v5 = vld [vmem:[%s280_s1 + $0x10] sm:$0xff]  ;;  %vm24_vm0 = vcmask 523264   ;;  %s222_s4 = smov [#allocation2]  }
   0x7   :  { %164 = vmatpush3.msra.mxu0 %v21_v2  ;;  %191 = vmatpush3.msra.mxu1 %v21_v2  ;;  %v17_v6 = vld [vmem:[%s280_s1 + $0x8] sm:$0xff]  ;;  %v16_v7 = vld [vmem:[%s280_s1] sm:$0xff]  ;;  %v14_v9 = vld [vmem:[%s279_s0 + $0x10] sm:$0xff]  ;;  %s132_s5 = sshll.u32 %s222_s4, 4  ;;  %vm122_vm1 = vcmask 261120   ;;  %s133_s5 = int_to_ptr.vmem [resolvable:$true] %s132_s5 }
   0x8   :  { %165 = vmatprep.subr.mxu0 %v20_v3  ;;  %184 = vmatprep.subr.mxu1 %v20_v3  ;;  %v12_v8 = vld [vmem:[%s279_s0] sm:$0xff]  ;;  %v13_v10 = vld [vmem:[%s279_s0 + $0x8] sm:$0xff]  ;;  %v15_v11 = vld [vmem:[%s279_s0 + $0x18] sm:$0xff]  ;;  %s200_s6 = scalar_lea.vmem %s133_s5, 512  ;;  %p205_p1 = scmp.lt.s32.totalorder %s133_s5, %s133_s5 }
   0x9   :  { %166 = vmatpush3.msra.mxu0 %v20_v3  ;;  %192 = vmatpush3.msra.mxu1 %v20_v3  ;;  %p201_p0 = scmp.ne.s32.totalorder %s133_s5, %s200_s6  ;;  %p206_p2 = scmp.lt.s32.totalorder %s200_s6, %s200_s6 }
   0xa   :  { %167 = vmatprep.subr.mxu0 %v19_v4  ;;  %185 = vmatprep.subr.mxu1 %v19_v4 }
   0xb   :  { %168 = vmatpush3.msra.mxu0 %v19_v4  ;;  %193 = vmatpush3.msra.mxu1 %v19_v4  ;;  %p207_p3 = por %p206_p2, %p205_p1 }
   0xc   :  { %169 = vmatprep.subr.mxu0 %v18_v5  ;;  %186 = vmatprep.subr.mxu1 %v18_v5 }
   0xd   :  { %170 = vmatpush3.msra.mxu0 %v18_v5  ;;  %194 = vmatpush3.msra.mxu1 %v18_v5  ;;  %p208_p4 = pnand %p207_p3, %p201_p0 }
   0xe   :  { %171 = vmatprep.subr.mxu0 %v17_v6  ;;  %187 = vmatprep.subr.mxu1 %v17_v6 }
   0xf   :  { %172 = vmatpush3.msra.mxu0 %v17_v6  ;;  %195 = vmatpush3.msra.mxu1 %v17_v6 }
  0x10   :  { %173 = vmatprep.subr.mxu0 %v16_v7  ;;  %188 = vmatprep.subr.mxu1 %v16_v7 }
  0x11   :  { %174 = vmatpush3.msra.mxu0 %v16_v7  ;;  %196 = vmatpush3.msra.mxu1 %v16_v7 }
  0x12   :  { %175 = vmatprep.mubr.msk.f32.mxu0 %vm24_vm0, %v12_v8  ;;  %178 = vmatprep.mubr.msk.f32.mxu1 %vm24_vm0, %v14_v9 }
  0x13   :  { %176 = vmatmul.mubr.msk.f32.vlgmr.msra.gmra.mxu0 %vm24_vm0, %v13_v10  ;;  %179 = vmatmul.mubr.msk.f32.vlgmr.msra.gmra.mxu1 %vm24_vm0, %v15_v11 }
  0xd3   :  { %v177_v12 = vpop.f32.mrf.mxu0  ;;  %v180_v13 = vpop.f32.mrf.mxu1 }
  0xd4   :  { %124 = vst.msk [vmem:[#allocation2 + $0x8] sm:$0xff] %vm122_vm1, %v177_v12  ;;  %126 = vst.msk [vmem:[#allocation2 + $0x18] sm:$0xff] %vm122_vm1, %v180_v13 }
  0xd5   :  { %v103_v14 = vpop.f32.mrf.mxu0  ;;  %v113_v15 = vpop.f32.mrf.mxu1 }
  0xd6   :  { %123 = vst.msk [vmem:[#allocation2] sm:$0xff] %vm122_vm1, %v103_v14  ;;  %125 = vst.msk [vmem:[#allocation2 + $0x10] sm:$0xff] %vm122_vm1, %v113_v15 }
  0xd7   :  { %211 = shalt.err (!%p208_p4)
}
  0xd8   :  { %s223_s0 = smov 128   ;;  %s224_s7 = smov 8  }
  0xd9   :  { %138 = dma.vmem_to_hbm [thread:$0]  %s133_s5, 512, %s281_s2, [#allocation3], %s223_s0, %s223_s0, %s224_s7  }
  0xda   :  { %220 = dma.done.wait [#allocation3], 512  }
  0xdb   :  { %221 = vsyncadd [#allocation3], 4294966784 }
  0xdc   :  { %142 = vsyncpa [#allocation3], 1 }

</bundles_post_ra>
